<compile_context>
chip_gen: v6e
topology: v6e:2x2x1
jax: 0.10.0
libtpu: 0.0.40
codegen_flags: <defaults>
</compile_context>

<pallas_src>
import numpy as np
import jax
import jax.numpy as jnp
from jax.experimental import pallas as pl
from jax.experimental.pallas import tpu as pltpu

_MAX_INFLIGHT_DMAS = 32
_TARGET_INFLIGHT_BYTES = 8 * 1024 * 1024
_XLA_FALLBACK_BYTES = 1 * 1024 * 1024


def _linspace_indices(length: int, num: int) -> np.ndarray:
    """Matches torch.linspace(0, length - 1, num).long() (values are >= 0)."""
    if num <= 0:
        return np.zeros((0,), dtype=np.int64)
    return np.linspace(0.0, float(length - 1), num).astype(np.int64)


def _detect_runs(idx: np.ndarray):
    """Split a static index list into maximal constant-stride runs.
    Returns [(start_value, stride, length, dst_offset), ...]."""
    runs = []
    i, n = 0, len(idx)
    while i < n:
        length, stride = 1, 1
        if i + 1 < n:
            stride = int(idx[i + 1] - idx[i])
            if stride >= 1:
                length = 2
                while (i + length < n
                       and int(idx[i + length] - idx[i + length - 1]) == stride):
                    length += 1
            else:
                stride, length = 1, 1  # duplicate/decreasing -> singleton
        runs.append((int(idx[i]), stride, length, i))
        i += length
    return runs


def _build_plan(index_groups, T: int):
    """Turn per-output static index lists into a DMA plan.

    A run (start, stride, length, dst) is coalesced into one DMA when its
    stride divides T (so a free reshape view (C, T//stride, stride, HW)
    exists); otherwise it is emitted as per-frame copies through the
    stride-1 view.  Returns (view strides, per-group plans of
    (view_pos, q, r, length, dst))."""
    strides = {1}
    raw = []
    for idx in index_groups:
        group = []
        for start, stride, length, dst in _detect_runs(np.asarray(idx)):
            if length > 1 and stride > 1 and T % stride == 0:
                strides.add(stride)
                group.append((stride, start // stride, start % stride, length, dst))
            elif stride == 1:
                group.append((1, start, 0, length, dst))
            else:
                for j in range(length):  # irregular tail -> per-frame copies
                    group.append((1, start + j * stride, 0, 1, dst + j))
        raw.append(group)
    order = tuple(sorted(strides))
    pos = {s: k for k, s in enumerate(order)}
    plans = tuple(tuple((pos[s], q, r, L, d) for (s, q, r, L, d) in g) for g in raw)
    return order, plans


def _make_gather_kernel(plans, n_views, n_sems):
    """Kernel factory: issue one HBM->HBM DMA per plan entry, keeping at most
    `n_sems` copies in flight (waits strictly in issue order)."""

    def kernel(*args):
        view_refs = args[:n_views]
        out_refs = args[n_views:n_views + len(plans)]
        sem = args[-1]
        pending = []  # DMA descriptors in issue order
        s = 0
        for out_ref, plan in zip(out_refs, plans):
            for (v, q, r, length, dst) in plan:
                # Slot reuse is safe: before reusing slot (s % n_sems) we wait
                # on the copy issued n_sems steps earlier, which used it.
                if len(pending) == n_sems:
                    pending.pop(0).wait()
                cp = pltpu.make_async_copy(
                    view_refs[v].at[:, pl.ds(q, length), pl.ds(r, 1), :],
                    out_ref.at[:, pl.ds(dst, length), :, :],
                    sem.at[s % n_sems],
                )
                cp.start()
                pending.append(cp)
                s += 1
        for cp in pending:
            cp.wait()

    return kernel


def _multi_gather(frames: jax.Array, index_groups):
    """frames: (C, T, H, W); index_groups: tuple of non-empty static index
    tuples.  Returns one (C, len(g), H, W) array per group, gathered along
    the frame axis by a single Pallas kernel using HBM->HBM DMAs."""
    C, T, H, W = frames.shape
    HW = H * W
    view_strides, plans = _build_plan(index_groups, T)
    # Free bitcast views of the same HBM buffer: view for stride s exposes
    # frame t at [t // s, t % s], so a stride-s run is a rectangular slab.
    views = [frames.reshape(C, T // s, s, HW) for s in view_strides]

    counts = tuple(len(g) for g in index_groups)
    total_copies = sum(len(p) for p in plans)
    frame_bytes = C * HW * frames.dtype.itemsize
    window = int(np.clip(pl.cdiv(_TARGET_INFLIGHT_BYTES, max(frame_bytes, 1)),
                         2, _MAX_INFLIGHT_DMAS))
    n_sems = max(1, min(total_copies, window))

    kernel = _make_gather_kernel(plans, len(views), n_sems)
    out_shape = tuple(jax.ShapeDtypeStruct((C, n, 1, HW), frames.dtype)
                      for n in counts)
    bytes_moved = 2 * sum(counts) * frame_bytes

    outs = pl.pallas_call(
        kernel,
        out_shape=out_shape,
        in_specs=[pl.BlockSpec(memory_space=pl.ANY) for _ in views],
        out_specs=tuple(pl.BlockSpec(memory_space=pl.ANY) for _ in counts),
        scratch_shapes=[pltpu.SemaphoreType.DMA((n_sems,))],
        compiler_params=pltpu.CompilerParams(has_side_effects=True),
        cost_estimate=pl.CostEstimate(flops=0, transcendentals=0,
                                      bytes_accessed=bytes_moved),
    )(*views)
    return [o.reshape(C, n, H, W) for o, n in zip(outs, counts)]


def pack_pathway(frames: jax.Array, max_frames: int, stride_fast: int,
                 slowfast_alpha: int, *, use_pallas=None):
    """JAX/Pallas equivalent of PackPathway.forward. Returns [slow, fast]."""
    C, T, H, W = frames.shape
    # No pre-slice copy: indices use the clipped length, gather uses the
    # original buffer (all indices < T_clip <= T).
    T_clip = min(T, max_frames)

    n_fast = T_clip // stride_fast
    fast_idx = _linspace_indices(T_clip, n_fast)
    n_slow = n_fast // slowfast_alpha
    slow_in_fast = _linspace_indices(n_fast, n_slow)
    slow_src = (fast_idx[slow_in_fast] if n_slow > 0
                else np.zeros((0,), np.int64))

    if n_fast == 0:
        empty = jnp.zeros((C, 0, H, W), frames.dtype)
        return [empty, empty]

    frame_bytes = C * H * W * frames.dtype.itemsize
    bytes_moved = 2 * (n_fast + n_slow) * frame_bytes
    if use_pallas is None:
        use_pallas = bytes_moved >= _XLA_FALLBACK_BYTES
    if not use_pallas:
        # Tiny inputs: custom-call + per-DMA fixed cost dwarfs the copy.
        fast = jnp.take(frames, jnp.asarray(fast_idx), axis=1)
        slow = (jnp.take(fast, jnp.asarray(slow_in_fast), axis=1)
                if n_slow > 0 else jnp.zeros((C, 0, H, W), frames.dtype))
        return [slow, fast]

    groups = [tuple(int(i) for i in fast_idx)]
    if n_slow > 0:
        groups.append(tuple(int(i) for i in slow_src))
    outs = _multi_gather(frames, tuple(groups))
    fast = outs[0]
    slow = outs[1] if n_slow > 0 else jnp.zeros((C, 0, H, W), frames.dtype)
    # TODO(synk): optional VMEM bounce-buffer for the shared slow/fast frames
    # (saves ~n_slow HBM reads) and a 2-TensorCore split of the DMA plan on
    # v7x when descriptor-issue rate, not bandwidth, is the limiter.
    return [slow, fast]


def _reference(frames_np, max_frames, stride_fast, slowfast_alpha):
    """Plain numpy mirror of the torch module."""
    f = frames_np[:, :max_frames, :, :]
    fi = _linspace_indices(f.shape[1], f.shape[1] // stride_fast)
    fast = f[:, fi, :, :]
    si = _linspace_indices(fast.shape[1], fast.shape[1] // slowfast_alpha)
    slow = fast[:, si, :, :]
    return slow, fast


if __name__ == "__main__":
    key = jax.random.PRNGKey(0)
    cases = [
        # (C, T, H, W, max_frames, stride_fast, slowfast_alpha)
        (4, 16, 16, 16, 16, 2, 4),   # canonical: one stride-2 run + tail frame
        (3, 20, 8, 16, 16, 2, 2),    # T > max_frames: no pre-slice copy path
        (2, 15, 8, 8, 32, 3, 2),     # stride-3 runs + per-frame slow fallback
    ]
    for C, T, H, W, mf, sf, al in cases:
        key, sub = jax.random.split(key)
        frames = jax.random.normal(sub, (C, T, H, W), dtype=jnp.float32)
        slow, fast = pack_pathway(frames, mf, sf, al, use_pallas=True)
        jax.block_until_ready(slow)
        jax.block_until_ready(fast)
        slow_ref, fast_ref = _reference(np.asarray(frames), mf, sf, al)
        assert fast.shape == fast_ref.shape and slow.shape == slow_ref.shape
        np.testing.assert_array_equal(np.asarray(fast), fast_ref)
        np.testing.assert_array_equal(np.asarray(slow), slow_ref)

    # Auto-dispatch path (tiny input -> plain XLA gather), for completeness.
    slow, fast = pack_pathway(frames, 16, 2, 4)
    jax.block_until_ready(fast)
    slow_ref, fast_ref = _reference(np.asarray(frames), 16, 2, 4)
    np.testing.assert_array_equal(np.asarray(fast), fast_ref)
    np.testing.assert_array_equal(np.asarray(slow), slow_ref)

    print("KERNEL_OK")
</pallas_src>

<mosaic_0001>
module attributes {stable_mosaic.version = 11 : i64} {
  func.func @kernel(%arg0: memref<4x16x1x256xf32, #tpu.memory_space<any>>, %arg1: memref<4x8x2x256xf32, #tpu.memory_space<any>>, %arg2: memref<4x8x1x256xf32, #tpu.memory_space<any>>, %arg3: memref<4x2x1x256xf32, #tpu.memory_space<any>>, %arg4: memref<4x!tpu.dma_semaphore, #tpu.memory_space<semaphore_mem>>) attributes {dimension_semantics = [], scalar_prefetch = 0 : i64, scratch_operands = 1 : i64, tpu.core_type = #tpu.core_type<tc>} {
    %c0_i32 = arith.constant 0 : i32
    %c0_i32_0 = arith.constant 0 : i32
    %c0_i32_1 = arith.constant 0 : i32
    %c0_i32_2 = arith.constant 0 : i32
    %c0_i32_3 = arith.constant 0 : i32
    %0 = tpu.memref_slice %arg1[%c0_i32_0, %c0_i32_1, %c0_i32_2, %c0_i32_3] : memref<4x8x2x256xf32, #tpu.memory_space<any>> -> memref<4x7x1x256xf32, #tpu.memory_space<any>>
    %c0_i32_4 = arith.constant 0 : i32
    %c0_i32_5 = arith.constant 0 : i32
    %c0_i32_6 = arith.constant 0 : i32
    %c0_i32_7 = arith.constant 0 : i32
    %1 = tpu.memref_slice %arg2[%c0_i32_4, %c0_i32_5, %c0_i32_6, %c0_i32_7] : memref<4x8x1x256xf32, #tpu.memory_space<any>> -> memref<4x7x1x256xf32, #tpu.memory_space<any>>
    %2 = tpu.memref_slice %arg4[%c0_i32] : memref<4x!tpu.dma_semaphore, #tpu.memory_space<semaphore_mem>> -> memref<1x!tpu.dma_semaphore, #tpu.memory_space<semaphore_mem>>
    %3 = tpu.memref_squeeze %2 : memref<1x!tpu.dma_semaphore, #tpu.memory_space<semaphore_mem>> -> memref<!tpu.dma_semaphore, #tpu.memory_space<semaphore_mem>>
    tpu.enqueue_dma source(%0 : memref<4x7x1x256xf32, #tpu.memory_space<any>>) target(%1 : memref<4x7x1x256xf32, #tpu.memory_space<any>>) target_semaphore(%3 : memref<!tpu.dma_semaphore, #tpu.memory_space<semaphore_mem>>)
    %c1_i32 = arith.constant 1 : i32
    %c0_i32_8 = arith.constant 0 : i32
    %c15_i32 = arith.constant 15 : i32
    %c0_i32_9 = arith.constant 0 : i32
    %c0_i32_10 = arith.constant 0 : i32
    %4 = tpu.memref_slice %arg0[%c0_i32_8, %c15_i32, %c0_i32_9, %c0_i32_10] : memref<4x16x1x256xf32, #tpu.memory_space<any>> -> memref<4x1x1x256xf32, #tpu.memory_space<any>>
    %c0_i32_11 = arith.constant 0 : i32
    %c7_i32 = arith.constant 7 : i32
    %c0_i32_12 = arith.constant 0 : i32
    %c0_i32_13 = arith.constant 0 : i32
    %5 = tpu.memref_slice %arg2[%c0_i32_11, %c7_i32, %c0_i32_12, %c0_i32_13] : memref<4x8x1x256xf32, #tpu.memory_space<any>> -> memref<4x1x1x256xf32, #tpu.memory_space<any>>
    %6 = tpu.memref_slice %arg4[%c1_i32] : memref<4x!tpu.dma_semaphore, #tpu.memory_space<semaphore_mem>> -> memref<1x!tpu.dma_semaphore, #tpu.memory_space<semaphore_mem>>
    %7 = tpu.memref_squeeze %6 : memref<1x!tpu.dma_semaphore, #tpu.memory_space<semaphore_mem>> -> memref<!tpu.dma_semaphore, #tpu.memory_space<semaphore_mem>>
    tpu.enqueue_dma source(%4 : memref<4x1x1x256xf32, #tpu.memory_space<any>>) target(%5 : memref<4x1x1x256xf32, #tpu.memory_space<any>>) target_semaphore(%7 : memref<!tpu.dma_semaphore, #tpu.memory_space<semaphore_mem>>)
    %c2_i32 = arith.constant 2 : i32
    %c0_i32_14 = arith.constant 0 : i32
    %c0_i32_15 = arith.constant 0 : i32
    %c0_i32_16 = arith.constant 0 : i32
    %c0_i32_17 = arith.constant 0 : i32
    %8 = tpu.memref_slice %arg0[%c0_i32_14, %c0_i32_15, %c0_i32_16, %c0_i32_17] : memref<4x16x1x256xf32, #tpu.memory_space<any>> -> memref<4x1x1x256xf32, #tpu.memory_space<any>>
    %c0_i32_18 = arith.constant 0 : i32
    %c0_i32_19 = arith.constant 0 : i32
    %c0_i32_20 = arith.constant 0 : i32
    %c0_i32_21 = arith.constant 0 : i32
    %9 = tpu.memref_slice %arg3[%c0_i32_18, %c0_i32_19, %c0_i32_20, %c0_i32_21] : memref<4x2x1x256xf32, #tpu.memory_space<any>> -> memref<4x1x1x256xf32, #tpu.memory_space<any>>
    %10 = tpu.memref_slice %arg4[%c2_i32] : memref<4x!tpu.dma_semaphore, #tpu.memory_space<semaphore_mem>> -> memref<1x!tpu.dma_semaphore, #tpu.memory_space<semaphore_mem>>
    %11 = tpu.memref_squeeze %10 : memref<1x!tpu.dma_semaphore, #tpu.memory_space<semaphore_mem>> -> memref<!tpu.dma_semaphore, #tpu.memory_space<semaphore_mem>>
    tpu.enqueue_dma source(%8 : memref<4x1x1x256xf32, #tpu.memory_space<any>>) target(%9 : memref<4x1x1x256xf32, #tpu.memory_space<any>>) target_semaphore(%11 : memref<!tpu.dma_semaphore, #tpu.memory_space<semaphore_mem>>)
    %c3_i32 = arith.constant 3 : i32
    %c0_i32_22 = arith.constant 0 : i32
    %c15_i32_23 = arith.constant 15 : i32
    %c0_i32_24 = arith.constant 0 : i32
    %c0_i32_25 = arith.constant 0 : i32
    %12 = tpu.memref_slice %arg0[%c0_i32_22, %c15_i32_23, %c0_i32_24, %c0_i32_25] : memref<4x16x1x256xf32, #tpu.memory_space<any>> -> memref<4x1x1x256xf32, #tpu.memory_space<any>>
    %c0_i32_26 = arith.constant 0 : i32
    %c1_i32_27 = arith.constant 1 : i32
    %c0_i32_28 = arith.constant 0 : i32
    %c0_i32_29 = arith.constant 0 : i32
    %13 = tpu.memref_slice %arg3[%c0_i32_26, %c1_i32_27, %c0_i32_28, %c0_i32_29] : memref<4x2x1x256xf32, #tpu.memory_space<any>> -> memref<4x1x1x256xf32, #tpu.memory_space<any>>
    %14 = tpu.memref_slice %arg4[%c3_i32] : memref<4x!tpu.dma_semaphore, #tpu.memory_space<semaphore_mem>> -> memref<1x!tpu.dma_semaphore, #tpu.memory_space<semaphore_mem>>
    %15 = tpu.memref_squeeze %14 : memref<1x!tpu.dma_semaphore, #tpu.memory_space<semaphore_mem>> -> memref<!tpu.dma_semaphore, #tpu.memory_space<semaphore_mem>>
    tpu.enqueue_dma source(%12 : memref<4x1x1x256xf32, #tpu.memory_space<any>>) target(%13 : memref<4x1x1x256xf32, #tpu.memory_space<any>>) target_semaphore(%15 : memref<!tpu.dma_semaphore, #tpu.memory_space<semaphore_mem>>)
    %c0_i32_30 = arith.constant 0 : i32
    %c0_i32_31 = arith.constant 0 : i32
    %c0_i32_32 = arith.constant 0 : i32
    %c0_i32_33 = arith.constant 0 : i32
    %c0_i32_34 = arith.constant 0 : i32
    %16 = tpu.memref_slice %arg1[%c0_i32_31, %c0_i32_32, %c0_i32_33, %c0_i32_34] : memref<4x8x2x256xf32, #tpu.memory_space<any>> -> memref<4x7x1x256xf32, #tpu.memory_space<any>>
    %c0_i32_35 = arith.constant 0 : i32
    %c0_i32_36 = arith.constant 0 : i32
    %c0_i32_37 = arith.constant 0 : i32
    %c0_i32_38 = arith.constant 0 : i32
    %17 = tpu.memref_slice %arg2[%c0_i32_35, %c0_i32_36, %c0_i32_37, %c0_i32_38] : memref<4x8x1x256xf32, #tpu.memory_space<any>> -> memref<4x7x1x256xf32, #tpu.memory_space<any>>
    %18 = tpu.memref_slice %arg4[%c0_i32_30] : memref<4x!tpu.dma_semaphore, #tpu.memory_space<semaphore_mem>> -> memref<1x!tpu.dma_semaphore, #tpu.memory_space<semaphore_mem>>
    %19 = tpu.memref_squeeze %18 : memref<1x!tpu.dma_semaphore, #tpu.memory_space<semaphore_mem>> -> memref<!tpu.dma_semaphore, #tpu.memory_space<semaphore_mem>>
    tpu.wait_dma2 semaphore(%19 : memref<!tpu.dma_semaphore, #tpu.memory_space<semaphore_mem>>) src(%16 : memref<4x7x1x256xf32, #tpu.memory_space<any>>) dst(%17 : memref<4x7x1x256xf32, #tpu.memory_space<any>>)
    %c1_i32_39 = arith.constant 1 : i32
    %c0_i32_40 = arith.constant 0 : i32
    %c15_i32_41 = arith.constant 15 : i32
    %c0_i32_42 = arith.constant 0 : i32
    %c0_i32_43 = arith.constant 0 : i32
    %20 = tpu.memref_slice %arg0[%c0_i32_40, %c15_i32_41, %c0_i32_42, %c0_i32_43] : memref<4x16x1x256xf32, #tpu.memory_space<any>> -> memref<4x1x1x256xf32, #tpu.memory_space<any>>
    %c0_i32_44 = arith.constant 0 : i32
    %c7_i32_45 = arith.constant 7 : i32
    %c0_i32_46 = arith.constant 0 : i32
    %c0_i32_47 = arith.constant 0 : i32
    %21 = tpu.memref_slice %arg2[%c0_i32_44, %c7_i32_45, %c0_i32_46, %c0_i32_47] : memref<4x8x1x256xf32, #tpu.memory_space<any>> -> memref<4x1x1x256xf32, #tpu.memory_space<any>>
    %22 = tpu.memref_slice %arg4[%c1_i32_39] : memref<4x!tpu.dma_semaphore, #tpu.memory_space<semaphore_mem>> -> memref<1x!tpu.dma_semaphore, #tpu.memory_space<semaphore_mem>>
    %23 = tpu.memref_squeeze %22 : memref<1x!tpu.dma_semaphore, #tpu.memory_space<semaphore_mem>> -> memref<!tpu.dma_semaphore, #tpu.memory_space<semaphore_mem>>
    tpu.wait_dma2 semaphore(%23 : memref<!tpu.dma_semaphore, #tpu.memory_space<semaphore_mem>>) src(%20 : memref<4x1x1x256xf32, #tpu.memory_space<any>>) dst(%21 : memref<4x1x1x256xf32, #tpu.memory_space<any>>)
    %c2_i32_48 = arith.constant 2 : i32
    %c0_i32_49 = arith.constant 0 : i32
    %c0_i32_50 = arith.constant 0 : i32
    %c0_i32_51 = arith.constant 0 : i32
    %c0_i32_52 = arith.constant 0 : i32
    %24 = tpu.memref_slice %arg0[%c0_i32_49, %c0_i32_50, %c0_i32_51, %c0_i32_52] : memref<4x16x1x256xf32, #tpu.memory_space<any>> -> memref<4x1x1x256xf32, #tpu.memory_space<any>>
    %c0_i32_53 = arith.constant 0 : i32
    %c0_i32_54 = arith.constant 0 : i32
    %c0_i32_55 = arith.constant 0 : i32
    %c0_i32_56 = arith.constant 0 : i32
    %25 = tpu.memref_slice %arg3[%c0_i32_53, %c0_i32_54, %c0_i32_55, %c0_i32_56] : memref<4x2x1x256xf32, #tpu.memory_space<any>> -> memref<4x1x1x256xf32, #tpu.memory_space<any>>
    %26 = tpu.memref_slice %arg4[%c2_i32_48] : memref<4x!tpu.dma_semaphore, #tpu.memory_space<semaphore_mem>> -> memref<1x!tpu.dma_semaphore, #tpu.memory_space<semaphore_mem>>
    %27 = tpu.memref_squeeze %26 : memref<1x!tpu.dma_semaphore, #tpu.memory_space<semaphore_mem>> -> memref<!tpu.dma_semaphore, #tpu.memory_space<semaphore_mem>>
    tpu.wait_dma2 semaphore(%27 : memref<!tpu.dma_semaphore, #tpu.memory_space<semaphore_mem>>) src(%24 : memref<4x1x1x256xf32, #tpu.memory_space<any>>) dst(%25 : memref<4x1x1x256xf32, #tpu.memory_space<any>>)
    %c3_i32_57 = arith.constant 3 : i32
    %c0_i32_58 = arith.constant 0 : i32
    %c15_i32_59 = arith.constant 15 : i32
    %c0_i32_60 = arith.constant 0 : i32
    %c0_i32_61 = arith.constant 0 : i32
    %28 = tpu.memref_slice %arg0[%c0_i32_58, %c15_i32_59, %c0_i32_60, %c0_i32_61] : memref<4x16x1x256xf32, #tpu.memory_space<any>> -> memref<4x1x1x256xf32, #tpu.memory_space<any>>
    %c0_i32_62 = arith.constant 0 : i32
    %c1_i32_63 = arith.constant 1 : i32
    %c0_i32_64 = arith.constant 0 : i32
    %c0_i32_65 = arith.constant 0 : i32
    %29 = tpu.memref_slice %arg3[%c0_i32_62, %c1_i32_63, %c0_i32_64, %c0_i32_65] : memref<4x2x1x256xf32, #tpu.memory_space<any>> -> memref<4x1x1x256xf32, #tpu.memory_space<any>>
    %30 = tpu.memref_slice %arg4[%c3_i32_57] : memref<4x!tpu.dma_semaphore, #tpu.memory_space<semaphore_mem>> -> memref<1x!tpu.dma_semaphore, #tpu.memory_space<semaphore_mem>>
    %31 = tpu.memref_squeeze %30 : memref<1x!tpu.dma_semaphore, #tpu.memory_space<semaphore_mem>> -> memref<!tpu.dma_semaphore, #tpu.memory_space<semaphore_mem>>
    tpu.wait_dma2 semaphore(%31 : memref<!tpu.dma_semaphore, #tpu.memory_space<semaphore_mem>>) src(%28 : memref<4x1x1x256xf32, #tpu.memory_space<any>>) dst(%29 : memref<4x1x1x256xf32, #tpu.memory_space<any>>)
    return
  }
}

</mosaic_0001>

<bundles_post_ra>
// kernel: tpu_custom_call.1
= control target key start
LH: loop header
LB: loop body
LE: loop exit
PB: predicated region body
PF: predicated region fallthrough
CT: control target
= control target key end

     0   :  { %s140_s12 = smov 512   ;;  %s141_s13 = smov 256   ;;  %s199_s0 = inlined_call_operand.hbm [shape: f32[4,16,1,256], index: 0, kind: input, shape index: {}]   ;;  %s200_s1 = inlined_call_operand.hbm [shape: f32[4,8,2,256], index: 1, kind: input, shape index: {}]   ;;  %s201_s2 = inlined_call_operand.hbm [shape: f32[4,8,1,256], index: 2, kind: output, shape index: {0}]   ;;  %s202_s3 = inlined_call_operand.hbm [shape: f32[4,2,1,256], index: 3, kind: output, shape index: {1}]  }
   0x1   :  { %15 = sst [smem:[#allocation4]] %s140_s12  ;;  %s142_s14 = smov 14  }
   0x2   :  { %17 = sst [smem:[#allocation4 + $0x1]] %s141_s13  ;;  %s143_s15 = smov 32  }
   0x3   :  { %19 = sst [smem:[#allocation4 + $0x2]] %s142_s14  ;;  %s144_s16 = smov 16  }
   0x4   :  { %21 = sst [smem:[#allocation4 + $0x3]] %s143_s15  ;;  %s145_s17 = smov 1  }
   0x5   :  { %23 = sst [smem:[#allocation4 + $0x4]] %s144_s16  ;;  %s146_s18 = smov [#allocation2]  }
   0x6   :  { %25 = sst [smem:[#allocation4 + $0x5]] %s145_s17  ;;  %s147_s19 = smov 131072  }
   0x7   :  { %s148_s20 = smov 0   ;;  %s28_s27 = scalar_lea.hbm %s199_s0, 480 }
   0x8   :  { %27 = dma.general %s200_s1, 896, %s201_s2, %s146_s18, %s147_s19, [#allocation4], %s148_s20, 0  }
   0x9   :  { %37 = sst [smem:[#allocation6]] %s140_s12  ;;  %s29_s30 = scalar_lea.hbm %s201_s2, 224 }
   0xa   :  { %39 = sst [smem:[#allocation6 + $0x1]] %s141_s13  ;;  %s149_s4 = smov 2  }
   0xb   :  { %41 = sst [smem:[#allocation6 + $0x2]] %s149_s4  ;;  %s150_s5 = smov [#allocation2 + $0x1]  }
   0xc   :  { %43 = dma.general %s28_s27, 128, %s29_s30, %s150_s5, %s147_s19, [#allocation6], %s148_s20, 0  }
   0xd   :  { %51 = sst [smem:[#allocation8]] %s140_s12  ;;  %s151_s6 = smov 64  }
   0xe   :  { %53 = sst [smem:[#allocation8 + $0x1]] %s151_s6  ;;  %s58_s8 = scalar_lea.hbm %s202_s3, 32 }
   0xf   :  { %55 = sst [smem:[#allocation8 + $0x2]] %s149_s4  ;;  %s152_s9 = smov [#allocation2 + $0x2]  }
  0x10   :  { %57 = dma.general %s199_s0, 128, %s202_s3, %s152_s9, %s147_s19, [#allocation8], %s148_s20, 0  }
  0x11   :  { %66 = sst [smem:[#allocation10]] %s140_s12  ;;  %s153_s2 = smov [#allocation2 + $0x3]  }
  0x12   :  { %68 = sst [smem:[#allocation10 + $0x1]] %s151_s6 }
  0x13   :  { %70 = sst [smem:[#allocation10 + $0x2]] %s149_s4 }
  0x14   :  { %72 = dma.general %s28_s27, 128, %s58_s8, %s153_s2, %s147_s19, [#allocation10], %s148_s20, 0  }
  0x15   :  { %132 = dma.done.wait [#allocation2], 896 }
  0x16   :  { %133 = vsyncadd [#allocation2], 4294966400 }
  0x17   :  { %134 = dma.done.wait [#allocation2 + $0x1], 128 }
  0x18   :  { %135 = vsyncadd [#allocation2 + $0x1], 4294967168 }
  0x19   :  { %136 = dma.done.wait [#allocation2 + $0x2], 128 }
  0x1a   :  { %137 = vsyncadd [#allocation2 + $0x2], 4294967168 }
  0x1b   :  { %138 = dma.done.wait [#allocation2 + $0x3], 128 }
  0x1c   :  { %139 = vsyncadd [#allocation2 + $0x3], 4294967168 }
  0x1d   :  { %87 = vsyncmov [#allocation2] }
  0x20   :  { %s88_s15 = vpop.sfrf %87 }
  0x21   :  { %p114_p0 = scmp.ne.s32.totalorder %s88_s15, 0 }
  0x23   :  { %92 = shalt.err (%p114_p0)  }
  0x24   :  { %94 = vsyncmov [#allocation2 + $0x1] }
  0x27   :  { %s95_s0 = vpop.sfrf %94 }
  0x28   :  { %p115_p1 = scmp.ne.s32.totalorder %s95_s0, 0 }
  0x2a   :  { %99 = shalt.err (%p115_p1)  }
  0x2b   :  { %101 = vsyncmov [#allocation2 + $0x2] }
  0x2e   :  { %s102_s3 = vpop.sfrf %101 }
  0x2f   :  { %p116_p2 = scmp.ne.s32.totalorder %s102_s3, 0 }
  0x31   :  { %106 = shalt.err (%p116_p2)  }
  0x32   :  { %108 = vsyncmov [#allocation2 + $0x3] }
  0x35   :  { %s109_s12 = vpop.sfrf %108 }
  0x36   :  { %p117_p3 = scmp.ne.s32.totalorder %s109_s12, 0 }
  0x38   :  { %113 = shalt.err (%p117_p3)  }

</bundles_post_ra>
